<compile_context>
chip_gen: v6e
topology: v6e:2x2x1
jax: 0.10.0
libtpu: 0.0.40
codegen_flags: <defaults>
</compile_context>

<pallas_src>
import math

import jax
import jax.numpy as jnp
from jax.experimental import pallas as pl
from jax.experimental.pallas import tpu as pltpu

_VMEM_LIMIT = 32 * 1024 * 1024   # safe scoped-VMEM budget on v5e / v6e / v7x
_RESIDENT_BYTES = 1 << 20        # whole-problem-in-VMEM path only if truly tiny
_SKINNY_M = 256                  # inference-style small batch threshold


# ----------------------------------------------------------------------------
# Helpers
# ----------------------------------------------------------------------------
def _round_up(v, m):
    return ((v + m - 1) // m) * m


def _pick_tile(dim, candidates):
    for c in candidates:
        if dim % c == 0:
            return c
    return None


def _buffered_spec(block_shape, index_map, depth):
    """Weight-stream BlockSpec with deeper buffering; falls back gracefully."""
    if depth > 2 and hasattr(pl, "Buffered"):
        try:
            return pl.BlockSpec(block_shape, index_map,
                                pipeline_mode=pl.Buffered(depth))
        except TypeError:
            pass
    return pl.BlockSpec(block_shape, index_map)


# ----------------------------------------------------------------------------
# Kernels
# ----------------------------------------------------------------------------
def _linear_kernel_resident(x_ref, wt_ref, b_ref, o_ref):
    """Whole-problem-resident linear. x:(M,K) wt:(K,N) b:(1,N) o:(M,N)."""
    acc = jnp.dot(x_ref[...], wt_ref[...], preferred_element_type=jnp.float32)
    o_ref[...] = (acc + b_ref[...]).astype(o_ref.dtype)


def _make_accum_kernel(k_axis):
    """Tiled linear that accumulates directly into the f32 output block.

    The output block index is constant over the K grid axis, so the block is
    resident in VMEM across the reduction.  It is initialized with the bias at
    k==0 (bias therefore added exactly once) and written back to HBM when the
    (M, N) block changes.
    """
    def kernel(x_ref, wt_ref, b_ref, o_ref):
        k = pl.program_id(k_axis)

        @pl.when(k == 0)
        def _init():
            o_ref[...] = jnp.broadcast_to(b_ref[...], o_ref.shape).astype(
                o_ref.dtype)

        o_ref[...] += jnp.dot(x_ref[...], wt_ref[...],
                              preferred_element_type=jnp.float32)

    return kernel


# ----------------------------------------------------------------------------
# pallas_call wrappers (one per path)
# ----------------------------------------------------------------------------
def _forward_resident(x, w_t, b2d):
    m = x.shape[0]
    n_pad = w_t.shape[1]
    return pl.pallas_call(
        _linear_kernel_resident,
        out_shape=jax.ShapeDtypeStruct((m, n_pad), jnp.float32),
        in_specs=[pl.BlockSpec(memory_space=pltpu.MemorySpace.VMEM)] * 3,
        out_specs=pl.BlockSpec(memory_space=pltpu.MemorySpace.VMEM),
        compiler_params=pltpu.CompilerParams(vmem_limit_bytes=_VMEM_LIMIT),
    )(x, w_t, b2d)


def _forward_skinny(x, w_t, b2d, tn, tk):
    """Skinny-M: x fully resident, grid over (N, K), weight tiles streamed."""
    m, k_pad = x.shape
    n_pad = w_t.shape[1]
    grid = (n_pad // tn, k_pad // tk)
    return pl.pallas_call(
        _make_accum_kernel(k_axis=1),
        out_shape=jax.ShapeDtypeStruct((m, n_pad), jnp.float32),
        grid_spec=pltpu.PrefetchScalarGridSpec(
            num_scalar_prefetch=0,
            grid=grid,
            in_specs=[
                pl.BlockSpec((m, tk), lambda j, k: (0, k)),        # resident x rows
                _buffered_spec((tk, tn), lambda j, k: (k, j), 3),  # W stream, deep
                pl.BlockSpec((1, tn), lambda j, k: (0, j)),
            ],
            out_specs=pl.BlockSpec((m, tn), lambda j, k: (0, j)),
        ),
        compiler_params=pltpu.CompilerParams(
            dimension_semantics=("parallel", "arbitrary"),
            vmem_limit_bytes=_VMEM_LIMIT,
        ),
    )(x, w_t, b2d)


def _forward_tiled(x, w_t, b2d, tm, tn, tk):
    """General path: 3-D (M/tm, N/tn, K/tk) grid, K innermost (reduction)."""
    m, k_pad = x.shape
    n_pad = w_t.shape[1]
    grid = (m // tm, n_pad // tn, k_pad // tk)
    return pl.pallas_call(
        _make_accum_kernel(k_axis=2),
        out_shape=jax.ShapeDtypeStruct((m, n_pad), jnp.float32),
        grid_spec=pltpu.PrefetchScalarGridSpec(
            num_scalar_prefetch=0,
            grid=grid,
            in_specs=[
                pl.BlockSpec((tm, tk), lambda i, j, k: (i, k)),
                pl.BlockSpec((tk, tn), lambda i, j, k: (k, j)),
                pl.BlockSpec((1, tn), lambda i, j, k: (0, j)),
            ],
            out_specs=pl.BlockSpec((tm, tn), lambda i, j, k: (i, j)),
        ),
        compiler_params=pltpu.CompilerParams(
            dimension_semantics=("parallel", "parallel", "arbitrary"),
            vmem_limit_bytes=_VMEM_LIMIT,
        ),
    )(x, w_t, b2d)


# ----------------------------------------------------------------------------
# Public API
# ----------------------------------------------------------------------------
def prepare_linear_params(weight, bias, compute_dtype=jnp.bfloat16):
    """One-time param re-layout (amortize across forward calls).

    torch stores W as [OUT, IN]; transpose once to [IN, OUT] so the kernel
    contracts x's last dim against W's leading dim with no in-kernel
    transpose.  IN and OUT are zero-padded to multiples of 128 so every load /
    store is lane-dense and the tile picker always succeeds.  The weight is
    cast once to bf16 (MXU-native); accumulation stays f32 in the kernel.
    """
    out_size, in_size = weight.shape
    out_pad = _round_up(out_size, 128)
    in_pad = _round_up(in_size, 128)
    w_t = jnp.transpose(weight)                                     # [IN, OUT]
    w_t = jnp.pad(w_t, ((0, in_pad - in_size), (0, out_pad - out_size)))
    w_t = w_t.astype(compute_dtype)
    b2d = jnp.pad(bias, (0, out_pad - out_size)).astype(jnp.float32)
    b2d = b2d.reshape(1, out_pad)
    return w_t, b2d, out_size, in_size


def linear_forward_prepared(x, w_t, b2d, out_size, in_size):
    """y = x @ W^T + b with params already in the prepared [K_pad, N_pad] layout."""
    orig_dtype = x.dtype
    lead_shape = x.shape[:-1]
    m = math.prod(lead_shape) if lead_shape else 1
    x2 = x.reshape(m, in_size).astype(w_t.dtype)

    k_pad, n_pad = w_t.shape
    if in_size != k_pad:
        x2 = jnp.pad(x2, ((0, 0), (0, k_pad - in_size)))

    itemsize = jnp.dtype(w_t.dtype).itemsize
    resident_bytes = (m * k_pad + k_pad * n_pad) * itemsize + (m + 1) * n_pad * 4

    if resident_bytes <= _RESIDENT_BYTES:
        # Genuinely tiny: no grid, no pipeline machinery.
        y = _forward_resident(x2, w_t, b2d)
    elif m <= _SKINNY_M:
        # Skinny-M (inference batch): weight-DMA bound -> maximize tn/tk and
        # deepen the weight stream's buffering.
        tn = _pick_tile(n_pad, (512, 256, 128))
        tk = _pick_tile(k_pad, (1024, 512, 256, 128))
        while n_pad // tn < 2 and tn > 128:   # keep both TCs busy on v7x
            tn //= 2
        y = _forward_skinny(x2, w_t, b2d, tn, tk)
    else:
        m_pad = _round_up(m, 128)
        if m_pad != m:
            x2 = jnp.pad(x2, ((0, m_pad - m), (0, 0)))
        tm = _pick_tile(m_pad, (512, 256, 128))
        tn = _pick_tile(n_pad, (512, 256, 128))
        tk = _pick_tile(k_pad, (1024, 512, 256, 128))
        # Keep at least 2 parallel (M, N) blocks so megacore / v7x's two
        # TensorCores can shard the grid.
        while (m_pad // tm) * (n_pad // tn) < 2:
            if tn > 128:
                tn //= 2
            elif tm > 128:
                tm //= 2
            else:
                break
        y = _forward_tiled(x2, w_t, b2d, tm, tn, tk)

    # TODO(synk): for very large padded outputs, fold this un-pad slice into
    # the kernel via a masked store instead of a separate XLA slice op.
    if y.shape != (m, out_size):
        y = y[:m, :out_size]
    y = y.reshape(*lead_shape, out_size)
    if orig_dtype != jnp.float32:
        y = y.astype(orig_dtype)
    return y


@jax.jit
def fully_connected_linear_forward(x, weight, bias):
    """Matches torch.nn.Linear forward: y = x @ weight.T + bias.

    bf16 MXU compute with f32 accumulation; f32 output.  For repeated
    inference, call prepare_linear_params() once and reuse
    linear_forward_prepared() so the transpose/pad/cast amortizes to zero.
    """
    w_t, b2d, out_size, in_size = prepare_linear_params(weight, bias)
    return linear_forward_prepared(x, w_t, b2d, out_size, in_size)


# ----------------------------------------------------------------------------
# Self-test
# ----------------------------------------------------------------------------
if __name__ == "__main__":
    def ref_linear(x, w, b, cast_bf16=True):
        if cast_bf16:   # same bf16-in / f32-accumulate numerics as the kernel
            x = x.astype(jnp.bfloat16).astype(jnp.float32)
            w = w.astype(jnp.bfloat16).astype(jnp.float32)
        return jnp.matmul(x, w.T, precision=jax.lax.Precision.HIGHEST) + b

    # ---- 1) Module-consistent small shapes (resident path) -----------------
    input_size, output_size, batch = 32, 16, 8
    kx, kw, kb = jax.random.split(jax.random.PRNGKey(0), 3)
    bound = 1.0 / (input_size ** 0.5)   # nn.Linear's U(-1/sqrt(in), 1/sqrt(in))
    x = jax.random.normal(kx, (batch, input_size), dtype=jnp.float32)
    weight = jax.random.uniform(kw, (output_size, input_size),
                                minval=-bound, maxval=bound, dtype=jnp.float32)
    bias = jax.random.uniform(kb, (output_size,),
                              minval=-bound, maxval=bound, dtype=jnp.float32)

    y = jax.block_until_ready(fully_connected_linear_forward(x, weight, bias))
    assert y.shape == (batch, output_size)
    assert jnp.allclose(y, ref_linear(x, weight, bias), atol=1e-3, rtol=1e-3)
    assert jnp.allclose(y, ref_linear(x, weight, bias, cast_bf16=False),
                        atol=3e-2, rtol=3e-2)

    # ---- 2) Skinny-M weight-streaming path ----------------------------------
    kx, kw, kb = jax.random.split(jax.random.PRNGKey(1), 3)
    M1, K1, N1 = 64, 1024, 1024
    x1 = jax.random.normal(kx, (M1, K1), dtype=jnp.float32)
    w1 = jax.random.normal(kw, (N1, K1), dtype=jnp.float32) * 0.02
    b1 = jax.random.normal(kb, (N1,), dtype=jnp.float32) * 0.02
    y1 = jax.block_until_ready(fully_connected_linear_forward(x1, w1, b1))
    assert y1.shape == (M1, N1)
    assert jnp.allclose(y1, ref_linear(x1, w1, b1), atol=1e-3, rtol=1e-3)

    # ---- 3) Large tiled path (parallel M/N grid, K-resident output acc) -----
    kx, kw, kb = jax.random.split(jax.random.PRNGKey(2), 3)
    M2, K2, N2 = 512, 512, 512
    x2 = jax.random.normal(kx, (M2, K2), dtype=jnp.float32)
    w2 = jax.random.normal(kw, (N2, K2), dtype=jnp.float32) * 0.02
    b2 = jax.random.normal(kb, (N2,), dtype=jnp.float32) * 0.02
    y2 = jax.block_until_ready(fully_connected_linear_forward(x2, w2, b2))
    assert y2.shape == (M2, N2)
    assert jnp.allclose(y2, ref_linear(x2, w2, b2), atol=1e-3, rtol=1e-3)

    print("KERNEL_OK")
</pallas_src>

<mosaic_0001>
module attributes {stable_mosaic.version = 11 : i64} {
  func.func @_linear_kernel_resident(%arg0: memref<8x128xbf16, #tpu.memory_space<vmem>>, %arg1: memref<128x128xbf16, #tpu.memory_space<vmem>>, %arg2: memref<1x128xf32, #tpu.memory_space<vmem>>, %arg3: memref<8x128xf32, #tpu.memory_space<vmem>>) attributes {dimension_semantics = [], scalar_prefetch = 0 : i64, scratch_operands = 0 : i64, tpu.core_type = #tpu.core_type<tc>} {
    %c0 = arith.constant 0 : index
    %c0_0 = arith.constant 0 : index
    %0 = vector.load %arg0[%c0, %c0_0] : memref<8x128xbf16, #tpu.memory_space<vmem>>, vector<8x128xbf16>
    %c0_1 = arith.constant 0 : index
    %c0_2 = arith.constant 0 : index
    %1 = vector.load %arg1[%c0_1, %c0_2] : memref<128x128xbf16, #tpu.memory_space<vmem>>, vector<128x128xbf16>
    %cst = arith.constant dense<0.000000e+00> : vector<8x128xf32>
    %2 = tpu.matmul %0, %1, %cst {dimension_numbers = #tpu.dot_dimension_numbers<[1], [0], [0], [1], [0, 0, 1, 1], [], []>} : vector<8x128xbf16>, vector<128x128xbf16>, vector<8x128xf32> -> vector<8x128xf32>
    %c0_3 = arith.constant 0 : index
    %c0_4 = arith.constant 0 : index
    %3 = vector.load %arg2[%c0_3, %c0_4] : memref<1x128xf32, #tpu.memory_space<vmem>>, vector<1x128xf32>
    %4 = vector.broadcast %3 : vector<1x128xf32> to vector<8x128xf32>
    %5 = arith.addf %2, %4 : vector<8x128xf32>
    %c0_5 = arith.constant 0 : index
    %c0_6 = arith.constant 0 : index
    %6 = vector.load %arg3[%c0_5, %c0_6] : memref<8x128xf32, #tpu.memory_space<vmem>>, vector<8x128xf32>
    tpu.vector_store %arg3[%c0_5, %c0_6], %5 {strides = array<i32>} : memref<8x128xf32, #tpu.memory_space<vmem>>, vector<8x128xf32>,
    return
  }
}

</mosaic_0001>

<bundles_post_ra>
// kernel: fully_connected_linear_forward.1
= control target key start
LH: loop header
LB: loop body
LE: loop exit
PB: predicated region body
PF: predicated region fallthrough
CT: control target
= control target key end

     0   :  { %v214_v1 = vmov 0.0   ;;  %vm215_vm0 = vmmov 0   ;;  %s270_s0 = inlined_call_operand.vmem [shape: bf16[8,128], index: 0, kind: input, shape index: {}]   ;;  %s271_s1 = inlined_call_operand.vmem [shape: bf16[128,128], index: 1, kind: input, shape index: {}]   ;;  %s272_s2 = inlined_call_operand.vmem [shape: f32[1,128], index: 2, kind: input, shape index: {}]   ;;  %s273_s3 = inlined_call_operand.hbm [shape: f32[8,128], index: 3, kind: output, shape index: {}]  }
   0x1   :  { %v184_v0 = vld [vmem:[%s271_s1 + $0x38] sm:$0xff]   ;;  %161 = vmatprep.subr.bf16.mxu0 %v214_v1  ;;  %v185_v2 = vld [vmem:[%s271_s1 + $0x30] sm:$0xff]   ;;  %177 = vmatprep.mubr.msk.bf16.mxu0 %vm215_vm0, %v214_v1  ;;  %v186_v3 = vld [vmem:[%s271_s1 + $0x28] sm:$0xff]  }
   0x2   :  { %162 = vmatpush3.bf16.msra.mxu0 %v184_v0 }
   0x3   :  { %163 = vmatprep.subr.bf16.mxu0 %v214_v1 }
   0x6   :  { %164 = vmatpush3.bf16.msra.mxu0 %v185_v2 }
   0x7   :  { %165 = vmatprep.subr.bf16.mxu0 %v214_v1 }
   0x8   :  { %8 = vsyncpa [#allocation3], 0  ;;  %v187_v4 = vld [vmem:[%s271_s1 + $0x20] sm:$0xff]   ;;  %v188_v5 = vld [vmem:[%s271_s1 + $0x18] sm:$0xff]   ;;  %s216_s5 = smov [#allocation2]  }
   0x9   :  { %v189_v6 = vld [vmem:[%s271_s1 + $0x10] sm:$0xff]   ;;  %v190_v7 = vld [vmem:[%s271_s1 + $0x8] sm:$0xff]   ;;  %v191_v8 = vld [vmem:[%s271_s1] sm:$0xff]   ;;  %s135_s6 = sshll.u32 %s216_s5, 4  ;;  %s136_s6 = int_to_ptr.vmem [resolvable:$true] %s135_s6 }
   0xa   :  { %166 = vmatpush3.bf16.msra.mxu0 %v186_v3  ;;  %v16_v9 = vld [vmem:[%s270_s0] sm:$0xf]  ;;  %s192_s1 = scalar_lea.vmem %s136_s6, 128  ;;  %p197_p1 = scmp.lt.s32.totalorder %s136_s6, %s136_s6 }
   0xb   :  { %167 = vmatprep.subr.bf16.mxu0 %v214_v1  ;;  %v143_v10 = vld [vmem:[%s272_s2] ss:$0 sm:$0xff]  ;;  %p193_p0 = scmp.ne.s32.totalorder %s136_s6, %s192_s1  ;;  %p198_p2 = scmp.lt.s32.totalorder %s192_s1, %s192_s1 }
   0xd   :  { %p199_p3 = por %p198_p2, %p197_p1 }
   0xe   :  { %168 = vmatpush3.bf16.msra.mxu0 %v187_v4 }
   0xf   :  { %169 = vmatprep.subr.bf16.mxu0 %v214_v1  ;;  %p200_p4 = pnand %p199_p3, %p193_p0 }
  0x12   :  { %170 = vmatpush3.bf16.msra.mxu0 %v188_v5 }
  0x13   :  { %171 = vmatprep.subr.bf16.mxu0 %v214_v1 }
  0x16   :  { %172 = vmatpush3.bf16.msra.mxu0 %v189_v6 }
  0x17   :  { %173 = vmatprep.subr.bf16.mxu0 %v214_v1 }
  0x1a   :  { %174 = vmatpush3.bf16.msra.mxu0 %v190_v7 }
  0x1b   :  { %175 = vmatprep.subr.bf16.mxu0 %v214_v1 }
  0x1e   :  { %176 = vmatpush3.bf16.msra.mxu0 %v191_v8 }
  0x21   :  { %178 = vmatmul.mubr.bf16.vlgmr.msra.gmra.mxu0 %v16_v9 }
  0xe1   :  { %v122_v11 = vpop.f32.mrf.mxu0 }
  0xe2   :  { %v123_v12 = vadd.f32 %v143_v10, %v122_v11 }
  0xe3   :  { %v179_v13 = vpop.f32.mrf.mxu0 }
  0xe4   :  { %128 = vst [vmem:[#allocation2] sm:$0xff] %v123_v12 }
  0xe5   :  { %v125_v14 = vpop.f32.mrf.mxu0 }
  0xe6   :  { %203 = shalt.err (!%p200_p4)
}
  0xe7   :  { %138 = dma.vmem_to_hbm [thread:$0]  %s136_s6, 128, %s273_s3, [#allocation3]   ;;  %v180_v15 = vpop.f32.mrf.mxu0 }
  0xe8   :  { %212 = dma.done.wait [#allocation3], 128  }
  0xe9   :  { %213 = vsyncadd [#allocation3], 4294967168 }
  0xea   :  { %142 = vsyncpa [#allocation3], 1 }

</bundles_post_ra>
